<compile_context>
chip_gen: v7x
topology: tpu7x:2x2x1
jax: 0.10.0
libtpu: 0.0.40
codegen_flags: <defaults>
</compile_context>

<pallas_src>
import functools

import jax
import jax.numpy as jnp
from jax.experimental import pallas as pl
from jax.experimental.pallas import tpu as pltpu

LANES = 128
MAX_TILE_ROWS = 4096   # 4096 x 128 x 4B = 2 MiB per f32 input block


def _sublane_align(dtype):
    # 8 sublanes for 32-bit, 16 for 16-bit, 32 for 8-bit dtypes.
    return max(8, 256 // (jnp.dtype(dtype).itemsize * 8))


def _round_up(x, m):
    return ((x + m - 1) // m) * m


def _dice_kernel(p_ref, t_ref, inter_ref, union_ref, *,
                 tile_rows, total_rows, mask_tail):
    i = pl.program_id(0)

    @pl.when(i == 0)
    def _():
        inter_ref[...] = jnp.zeros_like(inter_ref)
        union_ref[...] = jnp.zeros_like(union_ref)

    p = p_ref[...].astype(jnp.float32)
    t = t_ref[...].astype(jnp.float32)

    if mask_tail:
        # Last block may extend past the array; OOB rows are unspecified, so
        # zero them before accumulating.
        row = jax.lax.broadcasted_iota(jnp.int32, (tile_rows, LANES), 0)
        valid = (i * tile_rows + row) < total_rows
        zero = jnp.zeros_like(p)
        p = jnp.where(valid, p, zero)
        t = jnp.where(valid, t, zero)

    # Per-vreg (VPU-only) accumulation into (8, 128) accumulators: the
    # reshape keeps (8, 128) tiles intact, so the axis-0 sum is plain vreg
    # adds with no cross-lane work in the hot loop.
    groups = tile_rows // 8
    inter_ref[...] += jnp.sum((p * t).reshape(groups, 8, LANES), axis=0)
    union_ref[...] += jnp.sum((p * p + t * t).reshape(groups, 8, LANES), axis=0)


def dice_loss(preds, targets, smooth=1e-05):
    """Dice loss = 1 - (2*sum(p*t)+s) / (sum(p*p)+sum(t*t)+s), full reduction."""
    assert preds.shape == targets.shape
    n = preds.size

    align = max(_sublane_align(preds.dtype), _sublane_align(targets.dtype))
    p_flat = preds.reshape(-1)
    t_flat = targets.reshape(-1)

    # Minimal zero-padding so the flat array reshapes to (rows, 128) with a
    # dtype-legal sublane count.  Zero padding does not change any sum, and
    # when n is already aligned this is a no-op (no extra HBM pass).
    n_pad = _round_up(n, LANES * align)
    if n_pad != n:
        p_flat = jnp.pad(p_flat, (0, n_pad - n))
        t_flat = jnp.pad(t_flat, (0, n_pad - n))

    rows = n_pad // LANES
    tile_rows = min(MAX_TILE_ROWS, rows)
    grid = ((rows + tile_rows - 1) // tile_rows,)
    mask_tail = (rows % tile_rows) != 0

    p2d = p_flat.reshape(rows, LANES)
    t2d = t_flat.reshape(rows, LANES)

    kernel = functools.partial(
        _dice_kernel, tile_rows=tile_rows, total_rows=rows, mask_tail=mask_tail)

    bytes_accessed = (p2d.size * p2d.dtype.itemsize
                      + t2d.size * t2d.dtype.itemsize
                      + 2 * 8 * LANES * 4)

    inter, union = pl.pallas_call(
        kernel,
        out_shape=(
            jax.ShapeDtypeStruct((8, LANES), jnp.float32),
            jax.ShapeDtypeStruct((8, LANES), jnp.float32),
        ),
        grid_spec=pltpu.PrefetchScalarGridSpec(
            num_scalar_prefetch=0,
            grid=grid,
            in_specs=[
                pl.BlockSpec((tile_rows, LANES), lambda i: (i, 0)),
                pl.BlockSpec((tile_rows, LANES), lambda i: (i, 0)),
            ],
            out_specs=[
                pl.BlockSpec((8, LANES), lambda i: (0, 0)),
                pl.BlockSpec((8, LANES), lambda i: (0, 0)),
            ],
        ),
        compiler_params=pltpu.CompilerParams(
            dimension_semantics=("arbitrary",),
            vmem_limit_bytes=32 * 1024 * 1024,
        ),
        cost_estimate=pl.CostEstimate(
            flops=6 * n, transcendentals=0, bytes_accessed=bytes_accessed),
    )(p2d, t2d)

    # Tiny epilogue in plain JAX: 2 * (8, 128) partial slabs -> scalars.
    intersection = jnp.sum(inter)
    union_sum = jnp.sum(union)
    dice = (2.0 * intersection + smooth) / (union_sum + smooth)
    return 1.0 - dice


def dice_loss_ref(preds, targets, smooth=1e-05):
    intersection = jnp.sum(preds * targets)
    union = jnp.sum(preds * preds) + jnp.sum(targets * targets)
    dice = (2.0 * intersection + smooth) / (union + smooth)
    return 1.0 - dice


if __name__ == "__main__":
    key = jax.random.PRNGKey(0)
    k1, k2 = jax.random.split(key)
    # NCHW: batch=2, channels=4, spatial=16x16 (predicted masks vs targets)
    preds = jax.nn.sigmoid(jax.random.normal(k1, (2, 4, 16, 16), dtype=jnp.float32))
    targets = (jax.random.uniform(k2, (2, 4, 16, 16)) > 0.5).astype(jnp.float32)

    loss = jax.block_until_ready(dice_loss(preds, targets))
    ref = dice_loss_ref(preds, targets)

    assert jnp.allclose(loss, ref, rtol=1e-5, atol=1e-6), (loss, ref)
    print("KERNEL_OK")
</pallas_src>

<mosaic_0001>
module attributes {stable_mosaic.version = 11 : i64} {
  func.func @_dice_kernel(%arg0: i32, %arg1: memref<16x128xf32, #tpu.memory_space<vmem>>, %arg2: memref<16x128xf32, #tpu.memory_space<vmem>>, %arg3: memref<8x128xf32, #tpu.memory_space<vmem>>, %arg4: memref<8x128xf32, #tpu.memory_space<vmem>>) attributes {dimension_semantics = [#tpu.dimension_semantics<arbitrary>], iteration_bounds = array<i64: 1>, scalar_prefetch = 0 : i64, scratch_operands = 0 : i64, tpu.core_type = #tpu.core_type<tc>, window_params = [{transform_indices = @transform_0, window_bounds = array<i64: 16, 128>}, {transform_indices = @transform_1, window_bounds = array<i64: 16, 128>}, {pipeline_mode = #tpu.pipeline_mode<synchronous>, transform_indices = @transform_2, window_bounds = array<i64: 8, 128>}, {pipeline_mode = #tpu.pipeline_mode<synchronous>, transform_indices = @transform_3, window_bounds = array<i64: 8, 128>}]} {
    %c0_i32 = arith.constant 0 : i32
    %0 = arith.cmpi eq, %arg0, %c0_i32 : i32
    %1 = arith.extui %0 : i1 to i32
    %c0_i32_0 = arith.constant 0 : i32
    %2 = arith.cmpi ne, %1, %c0_i32_0 : i32
    scf.if %2 {
      %cst_13 = arith.constant 0.000000e+00 : f32
      %19 = vector.broadcast %cst_13 : f32 to vector<8x128xf32>
      %c0_14 = arith.constant 0 : index
      %c0_15 = arith.constant 0 : index
      %20 = vector.load %arg3[%c0_14, %c0_15] : memref<8x128xf32, #tpu.memory_space<vmem>>, vector<8x128xf32>
      tpu.vector_store %arg3[%c0_14, %c0_15], %19 {strides = array<i32>} : memref<8x128xf32, #tpu.memory_space<vmem>>, vector<8x128xf32>,
      %cst_16 = arith.constant 0.000000e+00 : f32
      %21 = vector.broadcast %cst_16 : f32 to vector<8x128xf32>
      %c0_17 = arith.constant 0 : index
      %c0_18 = arith.constant 0 : index
      %22 = vector.load %arg4[%c0_17, %c0_18] : memref<8x128xf32, #tpu.memory_space<vmem>>, vector<8x128xf32>
      tpu.vector_store %arg4[%c0_17, %c0_18], %21 {strides = array<i32>} : memref<8x128xf32, #tpu.memory_space<vmem>>, vector<8x128xf32>,
    } else {
    }
    %c0 = arith.constant 0 : index
    %c0_1 = arith.constant 0 : index
    %3 = vector.load %arg1[%c0, %c0_1] : memref<16x128xf32, #tpu.memory_space<vmem>>, vector<16x128xf32>
    %c0_2 = arith.constant 0 : index
    %c0_3 = arith.constant 0 : index
    %4 = vector.load %arg2[%c0_2, %c0_3] : memref<16x128xf32, #tpu.memory_space<vmem>>, vector<16x128xf32>
    %c0_4 = arith.constant 0 : index
    %c0_5 = arith.constant 0 : index
    %5 = vector.load %arg3[%c0_4, %c0_5] : memref<8x128xf32, #tpu.memory_space<vmem>>, vector<8x128xf32>
    %6 = arith.mulf %3, %4 : vector<16x128xf32>
    %7 = vector.shape_cast %6 : vector<16x128xf32> to vector<2x8x128xf32>
    %cst = arith.constant dense<0.000000e+00> : vector<8x128xf32>
    %8 = vector.multi_reduction <add>, %7, %cst [0] : vector<2x8x128xf32> to vector<8x128xf32>
    %9 = arith.addf %5, %8 : vector<8x128xf32>
    %c0_6 = arith.constant 0 : index
    %c0_7 = arith.constant 0 : index
    %10 = vector.load %arg3[%c0_6, %c0_7] : memref<8x128xf32, #tpu.memory_space<vmem>>, vector<8x128xf32>
    tpu.vector_store %arg3[%c0_6, %c0_7], %9 {strides = array<i32>} : memref<8x128xf32, #tpu.memory_space<vmem>>, vector<8x128xf32>,
    %c0_8 = arith.constant 0 : index
    %c0_9 = arith.constant 0 : index
    %11 = vector.load %arg4[%c0_8, %c0_9] : memref<8x128xf32, #tpu.memory_space<vmem>>, vector<8x128xf32>
    %12 = arith.mulf %3, %3 : vector<16x128xf32>
    %13 = arith.mulf %4, %4 : vector<16x128xf32>
    %14 = arith.addf %12, %13 : vector<16x128xf32>
    %15 = vector.shape_cast %14 : vector<16x128xf32> to vector<2x8x128xf32>
    %cst_10 = arith.constant dense<0.000000e+00> : vector<8x128xf32>
    %16 = vector.multi_reduction <add>, %15, %cst_10 [0] : vector<2x8x128xf32> to vector<8x128xf32>
    %17 = arith.addf %11, %16 : vector<8x128xf32>
    %c0_11 = arith.constant 0 : index
    %c0_12 = arith.constant 0 : index
    %18 = vector.load %arg4[%c0_11, %c0_12] : memref<8x128xf32, #tpu.memory_space<vmem>>, vector<8x128xf32>
    tpu.vector_store %arg4[%c0_11, %c0_12], %17 {strides = array<i32>} : memref<8x128xf32, #tpu.memory_space<vmem>>, vector<8x128xf32>,
    return
  }
  func.func @transform_0(%arg0: i32) -> (i32, i32) {
    %c0_i32 = arith.constant 0 : i32
    %c0_i32_0 = arith.constant 0 : i32
    return %arg0, %c0_i32 : i32, i32
  }
  func.func @transform_1(%arg0: i32) -> (i32, i32) {
    %c0_i32 = arith.constant 0 : i32
    %c0_i32_0 = arith.constant 0 : i32
    return %arg0, %c0_i32 : i32, i32
  }
  func.func @transform_2(%arg0: i32) -> (i32, i32) {
    %c0_i32 = arith.constant 0 : i32
    %c0_i32_0 = arith.constant 0 : i32
    %c0_i32_1 = arith.constant 0 : i32
    return %c0_i32, %c0_i32_0 : i32, i32
  }
  func.func @transform_3(%arg0: i32) -> (i32, i32) {
    %c0_i32 = arith.constant 0 : i32
    %c0_i32_0 = arith.constant 0 : i32
    %c0_i32_1 = arith.constant 0 : i32
    return %c0_i32, %c0_i32_0 : i32, i32
  }
}

</mosaic_0001>

<bundles_post_ra>
// kernel: tpu_custom_call.1
= control target key start
LH: loop header
LB: loop body
LE: loop exit
PB: predicated region body
PF: predicated region fallthrough
CT: control target
= control target key end

     0   :  { %9 = vsyncpa [#allocation3], 0  ;;  %s276_s0 = inlined_call_operand.hbm [shape: f32[16,128], index: 0, kind: input, shape index: {}]   ;;  %s277_s1 = inlined_call_operand.hbm [shape: f32[16,128], index: 1, kind: input, shape index: {}]   ;;  %s278_s2 = inlined_call_operand.hbm [shape: f32[8,128], index: 2, kind: output, shape index: {0}]   ;;  %s279_s3 = inlined_call_operand.hbm [shape: f32[8,128], index: 3, kind: output, shape index: {1}]  }
   0x1   :  { %10 = vsyncpa [#allocation6], 0 }
   0x2   :  { %11 = vsyncpa [#allocation4], 0 }
   0x3   :  { %12 = vsyncpa [#allocation9], 0  ;;  %s202_s12 = smov [#allocation2]   ;;  %s106_s16 = scalar_lea.hbm %s276_s0, 256 }
   0x4   :  { %s18_s13 = sshll.u32 %s202_s12, 4  ;;  %p107_p0 = scmp.ne.s32.totalorder %s276_s0, %s106_s16  ;;  %s19_s13 = int_to_ptr.vmem [resolvable:$true] %s18_s13 }
   0x5   :  { %p110_p1 = scmp.lt.u32.totalorder %s106_s16, %s276_s0 }
   0x7   :  { %p112_p2 = pnand %p110_p1, %p107_p0 }
   0x9   :  { %115 = shalt.err (!%p112_p2)
}
   0xa   :  { %s116_s21 = scalar_lea.vmem %s19_s13, 256  ;;  %p121_p4 = scmp.lt.s32.totalorder %s19_s13, %s19_s13 }
   0xb   :  { %p117_p3 = scmp.ne.s32.totalorder %s19_s13, %s116_s21  ;;  %p122_p5 = scmp.lt.s32.totalorder %s116_s21, %s116_s21 }
   0xd   :  { %p123_p6 = por %p122_p5, %p121_p4 }
   0xf   :  { %p124_p7 = pnand %p123_p6, %p117_p3 }
  0x11   :  { %127 = shalt.err (!%p124_p7)
}
  0x12   :  { %s203_s22 = smov 128   ;;  %s204_s23 = smov 8  }
  0x13   :  { %24 = dma.hbm_to_vmem [thread:$0]  %s276_s0, 256, %s19_s13, [#allocation3], %s203_s22, %s203_s22, %s204_s23  }
  0x14   :  { %s205_s26 = smov [#allocation5]   ;;  %s128_s30 = scalar_lea.hbm %s277_s1, 256 }
  0x15   :  { %s30_s27 = sshll.u32 %s205_s26, 4  ;;  %p129_p8 = scmp.ne.s32.totalorder %s277_s1, %s128_s30  ;;  %s31_s27 = int_to_ptr.vmem [resolvable:$true] %s30_s27 }
  0x16   :  { %p132_p9 = scmp.lt.u32.totalorder %s128_s30, %s277_s1 }
  0x18   :  { %p134_p10 = pnand %p132_p9, %p129_p8 }
  0x1a   :  { %137 = shalt.err (!%p134_p10)
}
  0x1b   :  { %s138_s8 = scalar_lea.vmem %s31_s27, 256  ;;  %p143_p12 = scmp.lt.s32.totalorder %s31_s27, %s31_s27 }
  0x1c   :  { %p139_p11 = scmp.ne.s32.totalorder %s31_s27, %s138_s8  ;;  %p144_p13 = scmp.lt.s32.totalorder %s138_s8, %s138_s8 }
  0x1e   :  { %p145_p0 = por %p144_p13, %p143_p12 }
  0x20   :  { %p146_p1 = pnand %p145_p0, %p139_p11 }
  0x22   :  { %149 = shalt.err (!%p146_p1)
}
  0x23   :  { %36 = dma.hbm_to_vmem [thread:$0]  %s277_s1, 256, %s31_s27, [#allocation6], %s203_s22, %s203_s22, %s204_s23  }
  0x24   :  { %194 = dma.done.wait [#allocation3], 256  }
  0x25   :  { %195 = vsyncadd [#allocation3], 4294967040 }
  0x26   :  { %196 = dma.done.wait [#allocation6], 256  }
  0x27   :  { %197 = vsyncadd [#allocation6], 4294967040  ;;  %v49_v0 = vld [vmem:[#allocation2] sm:$0xff]  ;;  %v50_v1 = vld [vmem:[#allocation2 + $0x8] sm:$0xff]  ;;  %s206_s10 = smov [#allocation7]   ;;  %s207_s1 = smov [#allocation8]  }
  0x28   :  { %v51_v2 = vld [vmem:[#allocation5] sm:$0xff]  ;;  %v52_v3 = vld [vmem:[#allocation5 + $0x8] sm:$0xff]  ;;  %v60_v5 = vmul.f32 %v49_v0, %v49_v0  ;;  %v61_v6 = vmul.f32 %v50_v1, %v50_v1  ;;  %s75_s11 = sshll.u32 %s206_s10, 4  ;;  %s85_s12 = sshll.u32 %s207_s1, 4  ;;  %s76_s11 = int_to_ptr.vmem [resolvable:$true] %s75_s11  ;;  %s86_s12 = int_to_ptr.vmem [resolvable:$true] %s85_s12 }
  0x29   :  { %v54_v4 = vmul.f32 %v51_v2, %v49_v0  ;;  %v62_v7 = vmul.f32 %v51_v2, %v51_v2  ;;  %v55_v8 = vmul.f32 %v52_v3, %v50_v1  ;;  %v63_v9 = vmul.f32 %v52_v3, %v52_v3  ;;  %s150_s13 = scalar_lea.vmem %s76_s11, 128  ;;  %p155_p3 = scmp.lt.s32.totalorder %s76_s11, %s76_s11 }
  0x2a   :  { %p151_p2 = scmp.ne.s32.totalorder %s76_s11, %s150_s13  ;;  %p156_p4 = scmp.lt.s32.totalorder %s150_s13, %s150_s13 }
  0x2b   :  { %v64_v10 = vadd.f32 %v62_v7, %v60_v5  ;;  %v56_v11 = vadd.f32 %v55_v8, %v54_v4  ;;  %v65_v12 = vadd.f32 %v63_v9, %v61_v6 }
  0x2c   :  { %p157_p5 = por %p156_p4, %p155_p3 }
  0x2d   :  { %v66_v13 = vadd.f32 %v65_v12, %v64_v10  ;;  %58 = vst [vmem:[#allocation7] sm:$0xff] %v56_v11 }
  0x2e   :  { %p158_p6 = pnand %p157_p5, %p151_p2 }
  0x30   :  { %161 = shalt.err (!%p158_p6)
}
  0x31   :  { %s162_s16 = scalar_lea.hbm %s278_s2, 128 }
  0x32   :  { %p163_p7 = scmp.ne.s32.totalorder %s278_s2, %s162_s16  ;;  %p166_p8 = scmp.lt.u32.totalorder %s162_s16, %s278_s2 }
  0x34   :  { %p168_p9 = pnand %p166_p8, %p163_p7 }
  0x36   :  { %171 = shalt.err (!%p168_p9)
}
  0x37   :  { %78 = dma.vmem_to_hbm [thread:$0]  %s76_s11, 128, %s278_s2, [#allocation4]   ;;  %68 = vst [vmem:[#allocation8] sm:$0xff] %v66_v13 }
  0x38   :  { %s172_s23 = scalar_lea.vmem %s86_s12, 128  ;;  %p177_p11 = scmp.lt.s32.totalorder %s86_s12, %s86_s12 }
  0x39   :  { %p173_p10 = scmp.ne.s32.totalorder %s86_s12, %s172_s23  ;;  %p178_p12 = scmp.lt.s32.totalorder %s172_s23, %s172_s23 }
  0x3b   :  { %p179_p13 = por %p178_p12, %p177_p11 }
  0x3d   :  { %p180_p0 = pnand %p179_p13, %p173_p10 }
  0x3f   :  { %183 = shalt.err (!%p180_p0)
}
  0x40   :  { %s184_s26 = scalar_lea.hbm %s279_s3, 128 }
  0x41   :  { %p185_p1 = scmp.ne.s32.totalorder %s279_s3, %s184_s26  ;;  %p188_p2 = scmp.lt.u32.totalorder %s184_s26, %s279_s3 }
  0x43   :  { %p190_p3 = pnand %p188_p2, %p185_p1 }
  0x45   :  { %193 = shalt.err (!%p190_p3)
}
  0x46   :  { %88 = dma.vmem_to_hbm [thread:$0]  %s86_s12, 128, %s279_s3, [#allocation9]  }
  0x47   :  { %198 = dma.done.wait [#allocation4], 128  }
  0x48   :  { %199 = vsyncadd [#allocation4], 4294967168 }
  0x49   :  { %200 = dma.done.wait [#allocation9], 128  }
  0x4a   :  { %201 = vsyncadd [#allocation9], 4294967168 }
  0x4b   :  { %95 = vsyncpa [#allocation3], 1 }
  0x4c   :  { %96 = vsyncpa [#allocation6], 1 }
  0x4d   :  { %97 = vsyncpa [#allocation4], 1 }
  0x4e   :  { %98 = vsyncpa [#allocation9], 1 }

</bundles_post_ra>
